<compile_context>
chip_gen: v6e
topology: v6e:2x2x1
jax: 0.10.0
libtpu: 0.0.40
codegen_flags: <defaults>
</compile_context>

<pallas_src>
import functools

import jax
import jax.numpy as jnp
from jax.experimental import pallas as pl
from jax.experimental.pallas import tpu as pltpu


def _round_up(n, m):
    return (n + m - 1) // m * m


def _fused_mlp_kernel(x_ref, *refs, n_layers, hidden_pads):
    """Fused MLP body (whole network, one batch tile per grid step).

    x_ref:      (tm, Din)        f32  VMEM (unpadded input features)
    refs:       w1, b1, ..., wn, bn, o_ref, h_scratch
      wi:       (Kin_i, Kout_i)  bf16 VMEM (PyTorch (out,in) pre-transposed, Kout padded to 128)
      bi:       (1, Kout_i)      f32  VMEM
      o_ref:    (tm, Dlast_pad)  VMEM output tile
      h_scratch:(tm, maxH_pad)   bf16 VMEM scratch staging inter-layer activations
    """
    o_ref = refs[2 * n_layers]
    h_scratch = refs[2 * n_layers + 1]

    # Fused cast (no host-side pad/cast pass of x).
    h = x_ref[...].astype(jnp.bfloat16)
    for i in range(n_layers):
        w_ref = refs[2 * i]
        b_ref = refs[2 * i + 1]
        y = jnp.dot(h, w_ref[...], preferred_element_type=jnp.float32)  # MXU, f32 acc
        y = y + b_ref[...]                                              # VPU (free slot)
        if i < n_layers - 1:
            y = jnp.maximum(y, 0.0)                                     # ReLU between layers
            hp = hidden_pads[i]
            # Stage the activation in VMEM with a controlled bf16 layout
            # (avoids uncontrolled f32 register spills for large hidden dims).
            h_scratch[:, :hp] = y.astype(jnp.bfloat16)
            h = h_scratch[:, :hp]
        else:
            o_ref[...] = y.astype(o_ref.dtype)


def init_mlp_params(layer_size, key):
    """Deterministic init mimicking nn.Linear default uniform(-1/sqrt(fan_in), ...)."""
    params = []
    for i in range(len(layer_size) - 1):
        fan_in, fan_out = layer_size[i], layer_size[i + 1]
        key, kw, kb = jax.random.split(key, 3)
        bound = 1.0 / (float(fan_in) ** 0.5)
        # PyTorch weight is (out, in); store transposed (in, out) for x @ W.
        w_t = jax.random.uniform(kw, (fan_in, fan_out), jnp.float32, -bound, bound)
        b = jax.random.uniform(kb, (fan_out,), jnp.float32, -bound, bound)
        params.append((w_t, b))
    return params


def prepare_padded_params(params):
    """Zero-pad output feature dims to 128 (lane-dense); input dim of layer i>0 is
    padded to match the previous layer's padded output; layer 0 keeps the true
    Din so x needs no host-side padding.  Weights bf16, biases f32."""
    padded = []
    prev_out_p = None
    for idx, (w_t, b) in enumerate(params):
        din, dout = w_t.shape
        din_p = din if idx == 0 else prev_out_p
        dout_p = _round_up(dout, 128)
        w_p = jnp.zeros((din_p, dout_p), jnp.bfloat16)
        w_p = w_p.at[:din, :dout].set(w_t.astype(jnp.bfloat16))
        b_p = jnp.zeros((1, dout_p), jnp.float32)
        b_p = b_p.at[0, :dout].set(b)
        padded.append((w_p, b_p))
        prev_out_p = dout_p
    return padded


def mlp_forward_fused(x, padded_params, out_features, out_dtype=jnp.float32):
    """Whole MLP in one pallas_call; batch tiled by a 1-D 'parallel' grid."""
    n_layers = len(padded_params)
    B, Din = x.shape
    assert padded_params[0][0].shape[0] == Din, "layer-0 weight rows must equal Din"
    Dout_p = padded_params[-1][0].shape[1]
    hidden_pads = tuple(w.shape[1] for w, _ in padded_params[:-1])
    max_hidden_p = max(hidden_pads) if hidden_pads else 128

    # ---- per-generation batch tile ----
    try:
        kind = jax.devices()[0].device_kind.lower()
    except Exception:  # pragma: no cover
        kind = ""
    tm_target = 128 if "v5" in kind else 256   # v6e/v7x MXU is 2x256x256, v5e is 4x128x128
    two_core = "v7" in kind                     # v7x: 2 TensorCores per chip

    if B <= 8:
        tm = B                                  # full-dim tile (always a legal block)
    elif B < tm_target:
        tm = _round_up(B, 8)
    else:
        tm = tm_target
    # v7x megacore: ensure >=2 grid steps when the batch allows it.
    if two_core and B >= 16 and pl.cdiv(B, tm) < 2:
        tm = _round_up(pl.cdiv(B, 2), 8)

    grid = (pl.cdiv(B, tm),)

    # ---- specs: x/out streamed per batch tile; weights/biases resident, single-buffered ----
    in_specs = [pl.BlockSpec((tm, Din), lambda i: (i, 0))]
    flat_inputs = [x]
    for w_p, b_p in padded_params:
        kin, kout = w_p.shape
        in_specs.append(pl.BlockSpec((kin, kout), lambda i: (0, 0),
                                     pipeline_mode=pl.Buffered(1)))
        in_specs.append(pl.BlockSpec((1, kout), lambda i: (0, 0),
                                     pipeline_mode=pl.Buffered(1)))
        flat_inputs.append(w_p)
        flat_inputs.append(b_p)

    # ---- explicit VMEM budget (single-buffered weights, double-buffered act tiles) ----
    weight_bytes = sum(int(w.size) * w.dtype.itemsize + int(b.size) * b.dtype.itemsize
                       for w, b in padded_params)
    act_bytes = 2 * tm * Din * x.dtype.itemsize
    out_bytes = 2 * tm * Dout_p * jnp.dtype(out_dtype).itemsize
    scr_bytes = tm * max_hidden_p * 2
    needed = weight_bytes + act_bytes + out_bytes + scr_bytes
    vmem_limit = int(min(max(needed + (8 << 20), 32 << 20), 64 << 20))

    kernel = functools.partial(_fused_mlp_kernel, n_layers=n_layers,
                               hidden_pads=hidden_pads)
    out_p = pl.pallas_call(
        kernel,
        out_shape=jax.ShapeDtypeStruct((B, Dout_p), out_dtype),
        grid=grid,
        in_specs=in_specs,
        out_specs=pl.BlockSpec((tm, Dout_p), lambda i: (i, 0)),
        scratch_shapes=[pltpu.VMEM((tm, max_hidden_p), jnp.bfloat16)],
        compiler_params=pltpu.CompilerParams(
            dimension_semantics=("parallel",),
            vmem_limit_bytes=vmem_limit),
    )(*flat_inputs)
    return out_p[:, :out_features]


def mlp_reference(x, params):
    """Pure-JAX f32 reference (matches the PyTorch module's forward)."""
    n = len(params)
    h = x
    for i, (w_t, b) in enumerate(params):
        h = h @ w_t + b
        if i < n - 1:
            h = jnp.maximum(h, 0.0)
    return h


if __name__ == "__main__":
    layer_size = [16, 32, 32, 8]   # small MLP consistent with the module's __init__
    batch = 8

    key = jax.random.PRNGKey(0)
    key, kx = jax.random.split(key)
    x = jax.random.normal(kx, (batch, layer_size[0]), jnp.float32)

    params = init_mlp_params(layer_size, key)
    padded_params = prepare_padded_params(params)

    out = mlp_forward_fused(x, padded_params, layer_size[-1])
    out = jax.block_until_ready(out)

    ref = mlp_reference(x, params)
    assert out.shape == (batch, layer_size[-1])
    # bf16 MXU operands with f32 accumulation -> loose tolerance vs. f32 reference.
    assert jnp.allclose(out, ref, atol=5e-2, rtol=5e-2), "mismatch vs reference"

    print("KERNEL_OK")
</pallas_src>

<mosaic_0001>
module attributes {stable_mosaic.version = 11 : i64} {
  func.func @_fused_mlp_kernel(%arg0: i32, %arg1: memref<8x16xf32, #tpu.memory_space<vmem>>, %arg2: memref<16x128xbf16, #tpu.memory_space<vmem>>, %arg3: memref<1x128xf32, #tpu.memory_space<vmem>>, %arg4: memref<128x128xbf16, #tpu.memory_space<vmem>>, %arg5: memref<1x128xf32, #tpu.memory_space<vmem>>, %arg6: memref<128x128xbf16, #tpu.memory_space<vmem>>, %arg7: memref<1x128xf32, #tpu.memory_space<vmem>>, %arg8: memref<8x128xf32, #tpu.memory_space<vmem>>, %arg9: memref<8x128xbf16, #tpu.memory_space<vmem>>) attributes {dimension_semantics = [#tpu.dimension_semantics<parallel>], iteration_bounds = array<i64: 1>, scalar_prefetch = 0 : i64, scratch_operands = 1 : i64, tpu.core_type = #tpu.core_type<tc>, window_params = [{transform_indices = @transform_0, window_bounds = array<i64: 8, 16>}, {pipeline_mode = #tpu.pipeline_mode<synchronous>, transform_indices = @transform_1, window_bounds = array<i64: 16, 128>}, {pipeline_mode = #tpu.pipeline_mode<synchronous>, transform_indices = @transform_2, window_bounds = array<i64: 1, 128>}, {pipeline_mode = #tpu.pipeline_mode<synchronous>, transform_indices = @transform_3, window_bounds = array<i64: 128, 128>}, {pipeline_mode = #tpu.pipeline_mode<synchronous>, transform_indices = @transform_4, window_bounds = array<i64: 1, 128>}, {pipeline_mode = #tpu.pipeline_mode<synchronous>, transform_indices = @transform_5, window_bounds = array<i64: 128, 128>}, {pipeline_mode = #tpu.pipeline_mode<synchronous>, transform_indices = @transform_6, window_bounds = array<i64: 1, 128>}, {transform_indices = @transform_7, window_bounds = array<i64: 8, 128>}]} {
    %c0 = arith.constant 0 : index
    %c0_0 = arith.constant 0 : index
    %0 = vector.load %arg1[%c0, %c0_0] : memref<8x16xf32, #tpu.memory_space<vmem>>, vector<8x16xf32>
    %1 = arith.truncf %0 : vector<8x16xf32> to vector<8x16xbf16>
    %c0_1 = arith.constant 0 : index
    %c0_2 = arith.constant 0 : index
    %2 = vector.load %arg2[%c0_1, %c0_2] : memref<16x128xbf16, #tpu.memory_space<vmem>>, vector<16x128xbf16>
    %cst = arith.constant dense<0.000000e+00> : vector<8x128xf32>
    %3 = tpu.matmul %1, %2, %cst {dimension_numbers = #tpu.dot_dimension_numbers<[1], [0], [0], [1], [0, 0, 1, 1], [], []>} : vector<8x16xbf16>, vector<16x128xbf16>, vector<8x128xf32> -> vector<8x128xf32>
    %c0_3 = arith.constant 0 : index
    %c0_4 = arith.constant 0 : index
    %4 = vector.load %arg3[%c0_3, %c0_4] : memref<1x128xf32, #tpu.memory_space<vmem>>, vector<1x128xf32>
    %5 = vector.broadcast %4 : vector<1x128xf32> to vector<8x128xf32>
    %6 = arith.addf %3, %5 : vector<8x128xf32>
    %cst_5 = arith.constant 0.000000e+00 : f32
    %7 = vector.broadcast %cst_5 : f32 to vector<8x128xf32>
    %8 = arith.maximumf %6, %7 : vector<8x128xf32>
    %9 = arith.truncf %8 : vector<8x128xf32> to vector<8x128xbf16>
    %c0_6 = arith.constant 0 : index
    %c0_7 = arith.constant 0 : index
    %10 = vector.load %arg9[%c0_6, %c0_7] : memref<8x128xbf16, #tpu.memory_space<vmem>>, vector<8x128xbf16>
    tpu.vector_store %arg9[%c0_6, %c0_7], %9 {strides = array<i32>} : memref<8x128xbf16, #tpu.memory_space<vmem>>, vector<8x128xbf16>,
    %c0_8 = arith.constant 0 : index
    %c0_9 = arith.constant 0 : index
    %11 = vector.load %arg9[%c0_8, %c0_9] : memref<8x128xbf16, #tpu.memory_space<vmem>>, vector<8x128xbf16>
    %c0_10 = arith.constant 0 : index
    %c0_11 = arith.constant 0 : index
    %12 = vector.load %arg4[%c0_10, %c0_11] : memref<128x128xbf16, #tpu.memory_space<vmem>>, vector<128x128xbf16>
    %cst_12 = arith.constant dense<0.000000e+00> : vector<8x128xf32>
    %13 = tpu.matmul %11, %12, %cst_12 {dimension_numbers = #tpu.dot_dimension_numbers<[1], [0], [0], [1], [0, 0, 1, 1], [], []>} : vector<8x128xbf16>, vector<128x128xbf16>, vector<8x128xf32> -> vector<8x128xf32>
    %c0_13 = arith.constant 0 : index
    %c0_14 = arith.constant 0 : index
    %14 = vector.load %arg5[%c0_13, %c0_14] : memref<1x128xf32, #tpu.memory_space<vmem>>, vector<1x128xf32>
    %15 = vector.broadcast %14 : vector<1x128xf32> to vector<8x128xf32>
    %16 = arith.addf %13, %15 : vector<8x128xf32>
    %cst_15 = arith.constant 0.000000e+00 : f32
    %17 = vector.broadcast %cst_15 : f32 to vector<8x128xf32>
    %18 = arith.maximumf %16, %17 : vector<8x128xf32>
    %19 = arith.truncf %18 : vector<8x128xf32> to vector<8x128xbf16>
    %c0_16 = arith.constant 0 : index
    %c0_17 = arith.constant 0 : index
    %20 = vector.load %arg9[%c0_16, %c0_17] : memref<8x128xbf16, #tpu.memory_space<vmem>>, vector<8x128xbf16>
    tpu.vector_store %arg9[%c0_16, %c0_17], %19 {strides = array<i32>} : memref<8x128xbf16, #tpu.memory_space<vmem>>, vector<8x128xbf16>,
    %c0_18 = arith.constant 0 : index
    %c0_19 = arith.constant 0 : index
    %21 = vector.load %arg9[%c0_18, %c0_19] : memref<8x128xbf16, #tpu.memory_space<vmem>>, vector<8x128xbf16>
    %c0_20 = arith.constant 0 : index
    %c0_21 = arith.constant 0 : index
    %22 = vector.load %arg6[%c0_20, %c0_21] : memref<128x128xbf16, #tpu.memory_space<vmem>>, vector<128x128xbf16>
    %cst_22 = arith.constant dense<0.000000e+00> : vector<8x128xf32>
    %23 = tpu.matmul %21, %22, %cst_22 {dimension_numbers = #tpu.dot_dimension_numbers<[1], [0], [0], [1], [0, 0, 1, 1], [], []>} : vector<8x128xbf16>, vector<128x128xbf16>, vector<8x128xf32> -> vector<8x128xf32>
    %c0_23 = arith.constant 0 : index
    %c0_24 = arith.constant 0 : index
    %24 = vector.load %arg7[%c0_23, %c0_24] : memref<1x128xf32, #tpu.memory_space<vmem>>, vector<1x128xf32>
    %25 = vector.broadcast %24 : vector<1x128xf32> to vector<8x128xf32>
    %26 = arith.addf %23, %25 : vector<8x128xf32>
    %c0_25 = arith.constant 0 : index
    %c0_26 = arith.constant 0 : index
    %27 = vector.load %arg8[%c0_25, %c0_26] : memref<8x128xf32, #tpu.memory_space<vmem>>, vector<8x128xf32>
    tpu.vector_store %arg8[%c0_25, %c0_26], %26 {strides = array<i32>} : memref<8x128xf32, #tpu.memory_space<vmem>>, vector<8x128xf32>,
    return
  }
  func.func @transform_0(%arg0: i32) -> (i32, i32) {
    %c0_i32 = arith.constant 0 : i32
    %c0_i32_0 = arith.constant 0 : i32
    return %arg0, %c0_i32 : i32, i32
  }
  func.func @transform_1(%arg0: i32) -> (i32, i32) {
    %c0_i32 = arith.constant 0 : i32
    %c0_i32_0 = arith.constant 0 : i32
    %c0_i32_1 = arith.constant 0 : i32
    return %c0_i32, %c0_i32_0 : i32, i32
  }
  func.func @transform_2(%arg0: i32) -> (i32, i32) {
    %c0_i32 = arith.constant 0 : i32
    %c0_i32_0 = arith.constant 0 : i32
    %c0_i32_1 = arith.constant 0 : i32
    return %c0_i32, %c0_i32_0 : i32, i32
  }
  func.func @transform_3(%arg0: i32) -> (i32, i32) {
    %c0_i32 = arith.constant 0 : i32
    %c0_i32_0 = arith.constant 0 : i32
    %c0_i32_1 = arith.constant 0 : i32
    return %c0_i32, %c0_i32_0 : i32, i32
  }
  func.func @transform_4(%arg0: i32) -> (i32, i32) {
    %c0_i32 = arith.constant 0 : i32
    %c0_i32_0 = arith.constant 0 : i32
    %c0_i32_1 = arith.constant 0 : i32
    return %c0_i32, %c0_i32_0 : i32, i32
  }
  func.func @transform_5(%arg0: i32) -> (i32, i32) {
    %c0_i32 = arith.constant 0 : i32
    %c0_i32_0 = arith.constant 0 : i32
    %c0_i32_1 = arith.constant 0 : i32
    return %c0_i32, %c0_i32_0 : i32, i32
  }
  func.func @transform_6(%arg0: i32) -> (i32, i32) {
    %c0_i32 = arith.constant 0 : i32
    %c0_i32_0 = arith.constant 0 : i32
    %c0_i32_1 = arith.constant 0 : i32
    return %c0_i32, %c0_i32_0 : i32, i32
  }
  func.func @transform_7(%arg0: i32) -> (i32, i32) {
    %c0_i32 = arith.constant 0 : i32
    %c0_i32_0 = arith.constant 0 : i32
    return %arg0, %c0_i32 : i32, i32
  }
}

</mosaic_0001>

<bundles_post_ra>
// kernel: tpu_custom_call.1
= control target key start
LH: loop header
LB: loop body
LE: loop exit
PB: predicated region body
PF: predicated region fallthrough
CT: control target
= control target key end

     0   :  { %12 = vsyncpa [#allocation4], 0  ;;  %s716_s0 = inlined_call_operand.hbm [shape: f32[8,16], index: 0, kind: input, shape index: {}]   ;;  %s717_s1 = inlined_call_operand.hbm [shape: bf16[16,128], index: 1, kind: input, shape index: {}]   ;;  %s718_s2 = inlined_call_operand.vmem [shape: f32[1,128], index: 2, kind: input, shape index: {}]   ;;  %s719_s3 = inlined_call_operand.hbm [shape: bf16[128,128], index: 3, kind: input, shape index: {}]   ;;  %s720_s4 = inlined_call_operand.vmem [shape: f32[1,128], index: 4, kind: input, shape index: {}]   ;;  %s721_s5 = inlined_call_operand.hbm [shape: bf16[128,128], index: 5, kind: input, shape index: {}]   ;;  %s722_s6 = inlined_call_operand.vmem [shape: f32[1,128], index: 6, kind: input, shape index: {}]   ;;  %s723_s7 = inlined_call_operand.hbm [shape: f32[8,128], index: 7, kind: output, shape index: {}]  }
   0x1   :  { %13 = vsyncpa [#allocation7], 0 }
   0x2   :  { %14 = vsyncpa [#allocation10], 0 }
   0x3   :  { %15 = vsyncpa [#allocation5], 0  ;;  %s611_s24 = smov [#allocation6]  }
   0x4   :  { %s31_s25 = sshll.u32 %s611_s24, 4  ;;  %s32_s25 = int_to_ptr.vmem [resolvable:$true] %s31_s25 }
   0x5   :  { %s511_s26 = scalar_lea.vmem %s32_s25, 128  ;;  %p516_p1 = scmp.lt.s32.totalorder %s32_s25, %s32_s25 }
   0x6   :  { %p512_p0 = scmp.ne.s32.totalorder %s32_s25, %s511_s26  ;;  %p517_p2 = scmp.lt.s32.totalorder %s511_s26, %s511_s26 }
   0x8   :  { %p518_p3 = por %p517_p2, %p516_p1 }
   0xa   :  { %p519_p4 = pnand %p518_p3, %p512_p0 }
   0xc   :  { %522 = shalt.err (!%p519_p4)
}
   0xd   :  { %s612_s27 = smov 64   ;;  %s613_s28 = smov 4  }
   0xe   :  { %37 = dma.hbm_to_vmem [thread:$0]  %s717_s1, 128, %s32_s25, [#allocation7], %s612_s27, %s612_s27, %s613_s28  }
   0xf   :  { %s614_s8 = smov [#allocation3]   ;;  %s615_s10 = smov [#allocation8]  }
  0x10   :  { %s22_s9 = sshll.u32 %s614_s8, 4  ;;  %s45_s11 = sshll.u32 %s615_s10, 4  ;;  %s23_s9 = int_to_ptr.vmem [resolvable:$true] %s22_s9  ;;  %s46_s11 = int_to_ptr.vmem [resolvable:$true] %s45_s11 }
  0x11   :  { %s531_s12 = scalar_lea.vmem %s23_s9, 128  ;;  %p536_p6 = scmp.lt.s32.totalorder %s23_s9, %s23_s9 }
  0x12   :  { %p532_p5 = scmp.ne.s32.totalorder %s23_s9, %s531_s12  ;;  %p537_p7 = scmp.lt.s32.totalorder %s531_s12, %s531_s12 }
  0x14   :  { %p538_p8 = por %p537_p7, %p536_p6 }
  0x16   :  { %p539_p9 = pnand %p538_p8, %p532_p5 }
  0x18   :  { %542 = shalt.err (!%p539_p9)
}
  0x19   :  { %25 = dma.hbm_to_vmem [thread:$0]  %s716_s0, 128, %s23_s9, [#allocation4]  }
  0x1a   :  { %s551_s15 = scalar_lea.vmem %s46_s11, 1024  ;;  %p556_p11 = scmp.lt.s32.totalorder %s46_s11, %s46_s11 }
  0x1b   :  { %p552_p10 = scmp.ne.s32.totalorder %s46_s11, %s551_s15  ;;  %p557_p12 = scmp.lt.s32.totalorder %s551_s15, %s551_s15 }
  0x1d   :  { %p558_p13 = por %p557_p12, %p556_p11 }
  0x1f   :  { %p559_p0 = pnand %p558_p13, %p552_p10 }
  0x21   :  { %562 = shalt.err (!%p559_p0)
}
  0x22   :  { %51 = dma.hbm_to_vmem [thread:$0]  %s719_s3, 1024, %s46_s11, [#allocation7], %s612_s27, %s612_s27, %s613_s28  }
  0x23   :  { %s616_s17 = smov [#allocation9]  }
  0x24   :  { %s59_s18 = sshll.u32 %s616_s17, 4  ;;  %s60_s18 = int_to_ptr.vmem [resolvable:$true] %s59_s18 }
  0x25   :  { %s571_s19 = scalar_lea.vmem %s60_s18, 1024  ;;  %p576_p2 = scmp.lt.s32.totalorder %s60_s18, %s60_s18 }
  0x26   :  { %p572_p1 = scmp.ne.s32.totalorder %s60_s18, %s571_s19  ;;  %p577_p3 = scmp.lt.s32.totalorder %s571_s19, %s571_s19 }
  0x28   :  { %p578_p4 = por %p577_p3, %p576_p2 }
  0x2a   :  { %p579_p5 = pnand %p578_p4, %p572_p1 }
  0x2c   :  { %582 = shalt.err (!%p579_p5)
}
  0x2d   :  { %65 = dma.hbm_to_vmem [thread:$0]  %s721_s5, 1024, %s60_s18, [#allocation10], %s612_s27, %s612_s27, %s613_s28  }
  0x2e   :  { %603 = dma.done.wait [#allocation4], 128  }
  0x2f   :  { %604 = vsyncadd [#allocation4], 4294967168 }
  0x30   :  { %605 = dma.done.wait [#allocation7], 1152  }
  0x31   :  { %606 = vsyncadd [#allocation7], 4294966144 }
  0x32   :  { %607 = dma.done.wait [#allocation10], 1024  }
  0x33   :  { %608 = vsyncadd [#allocation10], 4294966272  ;;  %v617_v0 = vmov 0.0   ;;  %vm618_vm0 = vmmov 0   ;;  %v486_v1 = vld [vmem:[#allocation6] sm:$0xff]   ;;  %v81_v2 = vld [vmem:[#allocation3] sm:$0xff] }
  0x34   :  { %431 = vmatprep.subr.bf16.mxu0 %v617_v0  ;;  %433 = vmatprep.mubr.msk.bf16.mxu0 %vm618_vm0, %v617_v0  ;;  %v82_v3 = vpack.c.bf16 %v81_v2, %v81_v2  ;;  %vm98_vm1 = vcmask 130048   ;;  %v487_v4 = vld [vmem:[#allocation8 + $0x38] sm:$0xff]   ;;  %v488_v5 = vld [vmem:[#allocation8 + $0x30] sm:$0xff]   ;;  %v489_v6 = vld [vmem:[#allocation8 + $0x28] sm:$0xff]   ;;  %s619_s24 = smov [#allocation11]  }
  0x35   :  { %437 = vmatprep.subr.bf16.mxu1 %v617_v0  ;;  %453 = vmatprep.mubr.msk.bf16.mxu1 %vm618_vm0, %v617_v0  ;;  %v490_v7 = vld [vmem:[#allocation8 + $0x20] sm:$0xff]   ;;  %v491_v8 = vld [vmem:[#allocation8 + $0x18] sm:$0xff]   ;;  %v492_v9 = vld [vmem:[#allocation8 + $0x10] sm:$0xff]   ;;  %s379_s25 = sshll.u32 %s619_s24, 4  ;;  %s380_s25 = int_to_ptr.vmem [resolvable:$true] %s379_s25 }
  0x36   :  { %432 = vmatpush3.bf16.msra.mxu0 %v486_v1  ;;  %438 = vmatpush3.bf16.msra.mxu1 %v487_v4  ;;  %v493_v10 = vld [vmem:[#allocation8 + $0x8] sm:$0xff]   ;;  %v494_v11 = vld [vmem:[#allocation8] sm:$0xff]   ;;  %v495_v12 = vld [vmem:[#allocation9 + $0x38] sm:$0xff]   ;;  %p588_p7 = scmp.lt.s32.totalorder %s380_s25, %s380_s25 }
  0x37   :  { %457 = vmatprep.subr.bf16.mxu0 %v617_v0  ;;  %439 = vmatprep.subr.bf16.mxu1 %v617_v0  ;;  %v496_v13 = vld [vmem:[#allocation9 + $0x30] sm:$0xff]   ;;  %v497_v14 = vld [vmem:[#allocation9 + $0x28] sm:$0xff]   ;;  %v498_v15 = vld [vmem:[#allocation9 + $0x20] sm:$0xff]  }
  0x38   :  { %v390_v16 = vld [vmem:[%s718_s2] ss:$0 sm:$0xff]  ;;  %v499_v25 = vld [vmem:[#allocation9 + $0x18] sm:$0xff]   ;;  %v500_v26 = vld [vmem:[#allocation9 + $0x10] sm:$0xff]  }
  0x39   :  { %434 = vmatmul.mubr.msk.bf16.vlgmr.msra.gmra.mxu0 %vm98_vm1, %v82_v3  ;;  %v501_v27 = vld [vmem:[#allocation9 + $0x8] sm:$0xff]   ;;  %v502_v28 = vld [vmem:[#allocation9] sm:$0xff]  }
  0x3a   :  { %473 = vmatprep.mubr.msk.bf16.mxu0 %vm618_vm0, %v617_v0  ;;  %440 = vmatpush3.bf16.msra.mxu1 %v488_v5  ;;  %v393_v29 = vld [vmem:[%s720_s4] ss:$0 sm:$0xff]  ;;  %s583_s4 = scalar_lea.vmem %s380_s25, 128 }
  0x3b   :  { %441 = vmatprep.subr.bf16.mxu1 %v617_v0  ;;  %458 = vmatpush3.bf16.msra.mxu0 %v495_v12  ;;  %v402_v38 = vld [vmem:[%s722_s6] ss:$0 sm:$0xff]  ;;  %p584_p6 = scmp.ne.s32.totalorder %s380_s25, %s583_s4  ;;  %p589_p8 = scmp.lt.s32.totalorder %s583_s4, %s583_s4 }
  0x3c   :  { %459 = vmatprep.subr.bf16.mxu0 %v617_v0 }
  0x3d   :  { %p590_p9 = por %p589_p8, %p588_p7 }
  0x3e   :  { %442 = vmatpush3.bf16.msra.mxu1 %v489_v6 }
  0x3f   :  { %443 = vmatprep.subr.bf16.mxu1 %v617_v0  ;;  %460 = vmatpush3.bf16.msra.mxu0 %v496_v13  ;;  %p591_p10 = pnand %p590_p9, %p584_p6 }
  0x40   :  { %461 = vmatprep.subr.bf16.mxu0 %v617_v0 }
  0x42   :  { %444 = vmatpush3.bf16.msra.mxu1 %v490_v7 }
  0x43   :  { %445 = vmatprep.subr.bf16.mxu1 %v617_v0  ;;  %462 = vmatpush3.bf16.msra.mxu0 %v497_v14 }
  0x44   :  { %463 = vmatprep.subr.bf16.mxu0 %v617_v0 }
  0x46   :  { %446 = vmatpush3.bf16.msra.mxu1 %v491_v8 }
  0x47   :  { %447 = vmatprep.subr.bf16.mxu1 %v617_v0  ;;  %464 = vmatpush3.bf16.msra.mxu0 %v498_v15 }
  0x48   :  { %465 = vmatprep.subr.bf16.mxu0 %v617_v0 }
  0x4a   :  { %448 = vmatpush3.bf16.msra.mxu1 %v492_v9 }
  0x4b   :  { %449 = vmatprep.subr.bf16.mxu1 %v617_v0  ;;  %466 = vmatpush3.bf16.msra.mxu0 %v499_v25 }
  0x4c   :  { %467 = vmatprep.subr.bf16.mxu0 %v617_v0 }
  0x4e   :  { %450 = vmatpush3.bf16.msra.mxu1 %v493_v10 }
  0x4f   :  { %451 = vmatprep.subr.bf16.mxu1 %v617_v0  ;;  %468 = vmatpush3.bf16.msra.mxu0 %v500_v26 }
  0x50   :  { %469 = vmatprep.subr.bf16.mxu0 %v617_v0 }
  0x52   :  { %452 = vmatpush3.bf16.msra.mxu1 %v494_v11 }
  0x53   :  { %470 = vmatpush3.bf16.msra.mxu0 %v501_v27 }
  0x54   :  { %471 = vmatprep.subr.bf16.mxu0 %v617_v0 }
  0x57   :  { %472 = vmatpush3.bf16.msra.mxu0 %v502_v28 }
  0xf9   :  { %v136_v17 = vpop.f32.mrf.mxu0 }
  0xfa   :  { %v137_v18 = vadd.f32 %v390_v16, %v136_v17 }
  0xfb   :  { %v435_v19 = vpop.f32.mrf.mxu0 }
  0xfc   :  { %v142_v20 = vmax.f32 %v137_v18, 0.0 }
  0xfd   :  { %v139_v21 = vpop.f32.mrf.mxu0 }
  0xfe   :  { %v143_v22 = vpack.c.bf16 %v142_v20, %v142_v20 }
  0xff   :  { %v436_v23 = vpop.f32.mrf.mxu0 }
 0x100   :  { %144 = vst [vmem:[#allocation2] sm:$0xf] %v143_v22 }
 0x107   :  { %v145_v24 = vld [vmem:[#allocation2] sm:$0xf] }
 0x108   :  { %454 = vmatmul.mubr.bf16.vlgmr.msra.gmra.mxu1 %v145_v24 }
 0x1c8   :  { %v251_v30 = vpop.f32.mrf.mxu1 }
 0x1c9   :  { %v252_v31 = vadd.f32 %v393_v29, %v251_v30 }
 0x1ca   :  { %v455_v32 = vpop.f32.mrf.mxu1 }
 0x1cb   :  { %v257_v33 = vmax.f32 %v252_v31, 0.0 }
 0x1cc   :  { %v254_v34 = vpop.f32.mrf.mxu1 }
 0x1cd   :  { %v258_v35 = vpack.c.bf16 %v257_v33, %v257_v33 }
 0x1ce   :  { %v456_v36 = vpop.f32.mrf.mxu1 }
 0x1cf   :  { %259 = vst [vmem:[#allocation2] sm:$0xf] %v258_v35 }
 0x1d6   :  { %v260_v37 = vld [vmem:[#allocation2] sm:$0xf] }
 0x1d7   :  { %474 = vmatmul.mubr.bf16.vlgmr.msra.gmra.mxu0 %v260_v37 }
 0x297   :  { %v366_v39 = vpop.f32.mrf.mxu0 }
 0x298   :  { %v367_v40 = vadd.f32 %v402_v38, %v366_v39 }
 0x299   :  { %v475_v41 = vpop.f32.mrf.mxu0 }
 0x29a   :  { %372 = vst [vmem:[#allocation11] sm:$0xff] %v367_v40 }
 0x29b   :  { %v369_v42 = vpop.f32.mrf.mxu0 }
 0x29c   :  { %594 = shalt.err (!%p591_p10)
}
 0x29d   :  { %382 = dma.vmem_to_hbm [thread:$0]  %s380_s25, 128, %s723_s7, [#allocation5]   ;;  %v476_v43 = vpop.f32.mrf.mxu0 }
 0x29e   :  { %609 = dma.done.wait [#allocation5], 128  }
 0x29f   :  { %610 = vsyncadd [#allocation5], 4294967168 }
 0x2a0   :  { %386 = vsyncpa [#allocation4], 1 }
 0x2a1   :  { %387 = vsyncpa [#allocation7], 1 }
 0x2a2   :  { %388 = vsyncpa [#allocation10], 1 }
 0x2a3   :  { %389 = vsyncpa [#allocation5], 1 }

</bundles_post_ra>
